<compile_context>
chip_gen: v6e
topology: v6e:2x2x1
jax: 0.10.0
libtpu: 0.0.40
codegen_flags: <defaults>
</compile_context>

<pallas_src>
import functools

import jax
import jax.numpy as jnp
import numpy as np
from jax.experimental import pallas as pl
from jax.experimental.pallas import tpu as pltpu


def _round_up(x, m):
    return (x + m - 1) // m * m


# ---------------------------------------------------------------------------
# Parameter padding (done ONCE at model init, not per call).
# ---------------------------------------------------------------------------
def pad_gcn_params(W1, b1, W2, b2, compute_dtype=jnp.bfloat16):
    """Zero-pads GCN parameters for the TPU kernels.

    W1: [in, hidden], W2: [hidden, out] (pre-transposed vs torch.nn.Linear);
    b1: [1, hidden], b2: [1, out].  hidden/out are padded to 128 lanes,
    in_feats only to a sublane multiple of 8.  Weights are cast to
    `compute_dtype` (matmul operands); biases stay float32 (VPU math is f32).
    """
    in_feats, hid = W1.shape
    out = W2.shape[1]
    inp = _round_up(in_feats, 8)
    hidp = _round_up(hid, 128)
    outp = _round_up(out, 128)
    f32 = jnp.float32
    W1p = jnp.zeros((inp, hidp), compute_dtype).at[:in_feats, :hid].set(
        W1.astype(compute_dtype))
    b1p = jnp.zeros((1, hidp), f32).at[:, :hid].set(b1.astype(f32))
    W2p = jnp.zeros((hidp, outp), compute_dtype).at[:hid, :out].set(
        W2.astype(compute_dtype))
    b2p = jnp.zeros((1, outp), f32).at[:, :out].set(b2.astype(f32))
    return dict(W1=W1p, b1=b1p, W2=W2p, b2=b2p,
                in_feats=in_feats, hid=hid, out=out,
                inp=inp, hidp=hidp, outp=outp, dtype=compute_dtype)


# ---------------------------------------------------------------------------
# Fused kernel: one whole (padded) graph per grid step, everything in VMEM.
# ---------------------------------------------------------------------------
def _gcn_fused_kernel(x_ref, a_ref, w1_ref, b1_ref, w2_ref, b2_ref, o_ref):
    f32 = jnp.float32
    a = a_ref[...]
    a_rowsum = jnp.sum(a.astype(f32), axis=-1, keepdims=True)      # [Np,1] XLU

    # Layer 1: A @ (X W1 + b1). Reassociate (exact) when inp < hidp so the
    # N^2 matmul carries the smaller feature dim:
    #   A @ (X W1 + b1) == (A X) W1 + rowsum(A) * b1
    if x_ref.shape[-1] < w1_ref.shape[-1]:
        ax = jnp.dot(a, x_ref[...], preferred_element_type=f32)
        h = jnp.dot(ax.astype(w1_ref.dtype), w1_ref[...],
                    preferred_element_type=f32)
        h = h + a_rowsum * b1_ref[...]
    else:
        xw = jnp.dot(x_ref[...], w1_ref[...], preferred_element_type=f32)
        xw = xw + b1_ref[...]
        h = jnp.dot(a, xw.astype(a.dtype), preferred_element_type=f32)
    h = jnp.maximum(h, 0.0)                                        # ReLU, f32 VPU

    # Layer 2: A @ (H W2 + b2). Original association while outp <= hidp,
    # otherwise the reassociated form (rowsum already computed).
    if w2_ref.shape[-1] <= w2_ref.shape[0]:
        hw = jnp.dot(h.astype(w2_ref.dtype), w2_ref[...],
                     preferred_element_type=f32) + b2_ref[...]
        o = jnp.dot(a, hw.astype(a.dtype), preferred_element_type=f32)
    else:
        ah = jnp.dot(a, h.astype(a.dtype), preferred_element_type=f32)
        o = jnp.dot(ah.astype(w2_ref.dtype), w2_ref[...],
                    preferred_element_type=f32)
        o = o + a_rowsum * b2_ref[...]
    o_ref[...] = o.astype(o_ref.dtype)


def gcn_encoder_fused(X, A, params):
    """Small-graph path: whole padded graph resident in VMEM.

    X: [G, N, in] or [N, in];  A: [G, N, N] or [N, N].
    A leading "parallel" grid axis batches G graphs into one pallas_call.
    Returns float32 [G, N, out] (or [N, out]).
    """
    squeeze = X.ndim == 2
    if squeeze:
        X, A = X[None], A[None]
    G, N, in_feats = X.shape
    assert in_feats == params["in_feats"]
    dt = params["dtype"]
    inp, hidp, outp = params["inp"], params["hidp"], params["outp"]
    Np = _round_up(N, 8)

    # Only per-call inputs are padded here; weights were padded once at init.
    Xp = jnp.zeros((G, Np, inp), dt).at[:, :N, :in_feats].set(X.astype(dt))
    Ap = jnp.zeros((G, Np, Np), dt).at[:, :N, :N].set(A.astype(dt))
    W1p, b1p, W2p, b2p = params["W1"], params["b1"], params["W2"], params["b2"]

    item = np.dtype(dt).itemsize
    flops = 2 * G * (Np * Np * min(inp, hidp) + Np * inp * hidp
                     + Np * hidp * outp + Np * Np * min(hidp, outp))
    bytes_accessed = ((Xp.size + Ap.size + W1p.size + W2p.size) * item
                      + (b1p.size + b2p.size + G * Np * outp) * 4)

    out = pl.pallas_call(
        _gcn_fused_kernel,
        out_shape=jax.ShapeDtypeStruct((G, Np, outp), jnp.float32),
        grid=(G,),
        in_specs=[
            pl.BlockSpec((None, Np, inp), lambda g: (g, 0, 0)),   # X[g]
            pl.BlockSpec((None, Np, Np), lambda g: (g, 0, 0)),    # A[g]
            pl.BlockSpec((inp, hidp), lambda g: (0, 0)),          # W1 (resident)
            pl.BlockSpec((1, hidp), lambda g: (0, 0)),            # b1
            pl.BlockSpec((hidp, outp), lambda g: (0, 0)),         # W2
            pl.BlockSpec((1, outp), lambda g: (0, 0)),            # b2
        ],
        out_specs=pl.BlockSpec((None, Np, outp), lambda g: (g, 0, 0)),
        compiler_params=pltpu.CompilerParams(
            dimension_semantics=("parallel",)),
        cost_estimate=pl.CostEstimate(flops=flops, transcendentals=0,
                                      bytes_accessed=bytes_accessed),
    )(Xp, Ap, W1p, b1p, W2p, b2p)

    out = out[:, :N, :params["out"]]
    return out[0] if squeeze else out


# ---------------------------------------------------------------------------
# Row-tiled kernels for large graphs: A streams, X / H / weights stay resident.
# ---------------------------------------------------------------------------
def _gcn_layer_tiled_kernel(a_ref, x_ref, w_ref, b_ref, o_ref, *, relu):
    """One GCN layer for a tile of A's rows, reassociated so only A streams:
         out_tile = A_tile @ (X W + b) == (A_tile @ X) W + rowsum(A_tile) * b
    (exact for arbitrary A; no per-tile recompute)."""
    f32 = jnp.float32
    a = a_ref[...]
    ax = jnp.dot(a, x_ref[...], preferred_element_type=f32)
    h = jnp.dot(ax.astype(w_ref.dtype), w_ref[...], preferred_element_type=f32)
    rs = jnp.sum(a.astype(f32), axis=-1, keepdims=True)
    h = h + rs * b_ref[...]
    if relu:
        h = jnp.maximum(h, 0.0)
    o_ref[...] = h.astype(o_ref.dtype)


def gcn_encoder_tiled(X, A, params, *, max_row_tile=1024,
                      vmem_budget_bytes=32 * 1024 * 1024, a_buffer_count=2):
    """Large-graph path: two row-tiled pallas_calls (one per GCN layer).

    A streams through VMEM as (tm, Np) row tiles over a "parallel" grid axis;
    X (layer 1) / H (layer 2) and the weights stay resident.  The row tile is
    the largest that fits `vmem_budget_bytes` (keep <= ~48 MiB on v7x's 64 MiB
    physical VMEM; raise on v5e/v6e for >=512-row tiles) and vmem_limit_bytes
    is set explicitly (above v5e's 16 MiB default scoped limit).
    """
    N, in_feats = X.shape
    assert in_feats == params["in_feats"]
    dt = params["dtype"]
    inp, hidp, outp = params["inp"], params["hidp"], params["outp"]
    item = np.dtype(dt).itemsize

    # Biggest row tile whose streamed A buffers + resident operands fit budget.
    Np0 = _round_up(N, 8)
    resident = (Np0 * max(inp, hidp) * item                 # X or H (resident)
                + (inp * hidp + hidp * outp) * item         # weights
                + (hidp + outp) * 4)                        # biases (f32)
    tm = 8
    for cand in (8, 16, 32, 64, 128, 256, 512, 1024, 2048):
        a_bytes = max(a_buffer_count, 2) * cand * Np0 * item
        o_bytes = 2 * cand * max(hidp, outp) * 4
        if cand <= Np0 and a_bytes + o_bytes + resident <= vmem_budget_bytes:
            tm = cand
    tm = min(tm, max_row_tile, Np0)
    Np = _round_up(N, tm)

    Xp = jnp.zeros((Np, inp), dt).at[:N, :in_feats].set(X.astype(dt))
    Ap = jnp.zeros((Np, Np), dt).at[:N, :N].set(A.astype(dt))

    grid = (Np // tm,)
    cp = pltpu.CompilerParams(dimension_semantics=("parallel",),
                              vmem_limit_bytes=vmem_budget_bytes)

    if a_buffer_count > 2:
        # Deeper buffering on the long sequential A stream if DMA is exposed.
        a_spec = pl.BlockSpec((tm, Np), lambda i: (i, 0),
                              pipeline_mode=pl.Buffered(a_buffer_count))
    else:
        a_spec = pl.BlockSpec((tm, Np), lambda i: (i, 0))

    def layer(a, x, w, b, out_dtype, relu):
        fin, fout = w.shape
        return pl.pallas_call(
            functools.partial(_gcn_layer_tiled_kernel, relu=relu),
            out_shape=jax.ShapeDtypeStruct((Np, fout), out_dtype),
            grid=grid,
            in_specs=[
                a_spec,                                        # A row tile (streams)
                pl.BlockSpec((Np, fin), lambda i: (0, 0)),     # X / H (resident)
                pl.BlockSpec((fin, fout), lambda i: (0, 0)),   # W (resident)
                pl.BlockSpec((1, fout), lambda i: (0, 0)),     # b (resident)
            ],
            out_specs=pl.BlockSpec((tm, fout), lambda i: (i, 0)),
            compiler_params=cp,
        )(a, x, w, b)

    # Layer 1 -> H in compute dtype (feeds layer 2's matmuls directly).
    H = layer(Ap, Xp, params["W1"], params["b1"], dt, relu=True)
    out = layer(Ap, H, params["W2"], params["b2"], jnp.float32, relu=False)
    return out[:N, :params["out"]]


# ---------------------------------------------------------------------------
# Reference + demo
# ---------------------------------------------------------------------------
def gcn_encoder_ref(X, A, W1, b1, W2, b2):
    H = A @ (X @ W1 + b1)
    H = jnp.maximum(H, 0.0)
    return A @ (H @ W2 + b2)


if __name__ == "__main__":
    # Shapes consistent with the module: small graphs, feat dims 32/64/32.
    G, N, in_feats, hidden_feats, out_feats = 3, 16, 32, 64, 32
    N_big = 384   # exercises the row-tiled path with a 3-step grid (tm=128)

    key = jax.random.PRNGKey(0)
    kw1, kb1, kw2, kb2, kxs, kas, kxb, kab = jax.random.split(key, 8)

    def make_graph(kx, ka, n):
        x = jax.random.normal(kx, (n, in_feats), dtype=jnp.float32)
        a_raw = (jax.random.uniform(ka, (n, n)) > 0.7).astype(jnp.float32)
        a_raw = jnp.maximum(a_raw, a_raw.T) + jnp.eye(n, dtype=jnp.float32)
        a = a_raw / jnp.sum(a_raw, axis=1, keepdims=True)
        return x, a

    # torch.nn.Linear weights are [out, in]; stored pre-transposed [in, out].
    W1 = jax.random.normal(kw1, (in_feats, hidden_feats), jnp.float32) * 0.1
    b1 = jax.random.normal(kb1, (1, hidden_feats), jnp.float32) * 0.1
    W2 = jax.random.normal(kw2, (hidden_feats, out_feats), jnp.float32) * 0.1
    b2 = jax.random.normal(kb2, (1, out_feats), jnp.float32) * 0.1

    # Pad parameters ONCE (hoisted out of the per-call path).
    params_f32 = pad_gcn_params(W1, b1, W2, b2, compute_dtype=jnp.float32)
    params_bf16 = pad_gcn_params(W1, b1, W2, b2, compute_dtype=jnp.bfloat16)

    # --- batched small graphs (fused kernel, grid over graphs) ---
    xs, adjs = [], []
    for kx, ka in zip(jax.random.split(kxs, G), jax.random.split(kas, G)):
        x, a = make_graph(kx, ka, N)
        xs.append(x)
        adjs.append(a)
    Xs, As = jnp.stack(xs), jnp.stack(adjs)
    ref = jax.vmap(lambda x, a: gcn_encoder_ref(x, a, W1, b1, W2, b2))(Xs, As)

    out_f32 = jax.block_until_ready(gcn_encoder_fused(Xs, As, params_f32))
    np.testing.assert_allclose(np.asarray(out_f32), np.asarray(ref),
                               rtol=1e-5, atol=1e-5)

    out_bf16 = jax.block_until_ready(gcn_encoder_fused(Xs, As, params_bf16))
    # bf16 matmul operands loosen tolerance (structure already verified exactly
    # by the f32 run above).
    np.testing.assert_allclose(np.asarray(out_bf16), np.asarray(ref),
                               rtol=1e-1, atol=1e-1)

    # --- larger graph (row-tiled two-pass kernels) ---
    Xb, Ab = make_graph(kxb, kab, N_big)
    ref_big = gcn_encoder_ref(Xb, Ab, W1, b1, W2, b2)

    out_big_f32 = jax.block_until_ready(
        gcn_encoder_tiled(Xb, Ab, params_f32, max_row_tile=128))
    np.testing.assert_allclose(np.asarray(out_big_f32), np.asarray(ref_big),
                               rtol=1e-4, atol=1e-4)

    out_big_bf16 = jax.block_until_ready(
        gcn_encoder_tiled(Xb, Ab, params_bf16, max_row_tile=128))
    np.testing.assert_allclose(np.asarray(out_big_bf16), np.asarray(ref_big),
                               rtol=1e-1, atol=1e-1)

    print("KERNEL_OK")
</pallas_src>

<mosaic_0001>
module attributes {stable_mosaic.version = 11 : i64} {
  func.func @_gcn_fused_kernel(%arg0: i32, %arg1: memref<1x16x32xf32, #tpu.memory_space<vmem>>, %arg2: memref<1x16x16xf32, #tpu.memory_space<vmem>>, %arg3: memref<32x128xf32, #tpu.memory_space<vmem>>, %arg4: memref<1x128xf32, #tpu.memory_space<vmem>>, %arg5: memref<128x128xf32, #tpu.memory_space<vmem>>, %arg6: memref<1x128xf32, #tpu.memory_space<vmem>>, %arg7: memref<1x16x128xf32, #tpu.memory_space<vmem>>) attributes {dimension_semantics = [#tpu.dimension_semantics<parallel>], iteration_bounds = array<i64: 3>, scalar_prefetch = 0 : i64, scratch_operands = 0 : i64, tpu.core_type = #tpu.core_type<tc>, window_params = [{transform_indices = @transform_0, window_bounds = array<i64: 1, 16, 32>}, {transform_indices = @transform_1, window_bounds = array<i64: 1, 16, 16>}, {pipeline_mode = #tpu.pipeline_mode<synchronous>, transform_indices = @transform_2, window_bounds = array<i64: 32, 128>}, {pipeline_mode = #tpu.pipeline_mode<synchronous>, transform_indices = @transform_3, window_bounds = array<i64: 1, 128>}, {pipeline_mode = #tpu.pipeline_mode<synchronous>, transform_indices = @transform_4, window_bounds = array<i64: 128, 128>}, {pipeline_mode = #tpu.pipeline_mode<synchronous>, transform_indices = @transform_5, window_bounds = array<i64: 1, 128>}, {transform_indices = @transform_6, window_bounds = array<i64: 1, 16, 128>}]} {
    %c0 = arith.constant 0 : index
    %c0_0 = arith.constant 0 : index
    %c0_1 = arith.constant 0 : index
    %0 = vector.load %arg2[%c0, %c0_0, %c0_1] : memref<1x16x16xf32, #tpu.memory_space<vmem>>, vector<1x16x16xf32>
    %1 = vector.shape_cast %0 : vector<1x16x16xf32> to vector<16x16xf32>
    %cst = arith.constant dense<0.000000e+00> : vector<16xf32>
    %2 = vector.multi_reduction <add>, %1, %cst [1] : vector<16x16xf32> to vector<16xf32>
    %3 = vector.shape_cast %2 : vector<16xf32> to vector<16x1xf32>
    %c0_2 = arith.constant 0 : index
    %c0_3 = arith.constant 0 : index
    %c0_4 = arith.constant 0 : index
    %4 = vector.load %arg1[%c0_2, %c0_3, %c0_4] : memref<1x16x32xf32, #tpu.memory_space<vmem>>, vector<1x16x32xf32>
    %5 = vector.shape_cast %4 : vector<1x16x32xf32> to vector<16x32xf32>
    %cst_5 = arith.constant dense<0.000000e+00> : vector<16x32xf32>
    %6 = tpu.matmul %1, %5, %cst_5 {dimension_numbers = #tpu.dot_dimension_numbers<[1], [0], [0], [1], [0, 0, 1, 1], [], []>} : vector<16x16xf32>, vector<16x32xf32>, vector<16x32xf32> -> vector<16x32xf32>
    %c0_6 = arith.constant 0 : index
    %c0_7 = arith.constant 0 : index
    %7 = vector.load %arg3[%c0_6, %c0_7] : memref<32x128xf32, #tpu.memory_space<vmem>>, vector<32x128xf32>
    %cst_8 = arith.constant dense<0.000000e+00> : vector<16x128xf32>
    %8 = tpu.matmul %6, %7, %cst_8 {dimension_numbers = #tpu.dot_dimension_numbers<[1], [0], [0], [1], [0, 0, 1, 1], [], []>} : vector<16x32xf32>, vector<32x128xf32>, vector<16x128xf32> -> vector<16x128xf32>
    %c0_9 = arith.constant 0 : index
    %c0_10 = arith.constant 0 : index
    %9 = vector.load %arg4[%c0_9, %c0_10] : memref<1x128xf32, #tpu.memory_space<vmem>>, vector<1x128xf32>
    %10 = vector.broadcast %3 : vector<16x1xf32> to vector<16x128xf32>
    %11 = vector.broadcast %9 : vector<1x128xf32> to vector<16x128xf32>
    %12 = arith.mulf %10, %11 : vector<16x128xf32>
    %13 = arith.addf %8, %12 : vector<16x128xf32>
    %cst_11 = arith.constant 0.000000e+00 : f32
    %14 = vector.broadcast %cst_11 : f32 to vector<16x128xf32>
    %15 = arith.maximumf %13, %14 : vector<16x128xf32>
    %c0_12 = arith.constant 0 : index
    %c0_13 = arith.constant 0 : index
    %16 = vector.load %arg5[%c0_12, %c0_13] : memref<128x128xf32, #tpu.memory_space<vmem>>, vector<128x128xf32>
    %cst_14 = arith.constant dense<0.000000e+00> : vector<16x128xf32>
    %17 = tpu.matmul %15, %16, %cst_14 {dimension_numbers = #tpu.dot_dimension_numbers<[1], [0], [0], [1], [0, 0, 1, 1], [], []>} : vector<16x128xf32>, vector<128x128xf32>, vector<16x128xf32> -> vector<16x128xf32>
    %c0_15 = arith.constant 0 : index
    %c0_16 = arith.constant 0 : index
    %18 = vector.load %arg6[%c0_15, %c0_16] : memref<1x128xf32, #tpu.memory_space<vmem>>, vector<1x128xf32>
    %19 = vector.broadcast %18 : vector<1x128xf32> to vector<16x128xf32>
    %20 = arith.addf %17, %19 : vector<16x128xf32>
    %cst_17 = arith.constant dense<0.000000e+00> : vector<16x128xf32>
    %21 = tpu.matmul %1, %20, %cst_17 {dimension_numbers = #tpu.dot_dimension_numbers<[1], [0], [0], [1], [0, 0, 1, 1], [], []>} : vector<16x16xf32>, vector<16x128xf32>, vector<16x128xf32> -> vector<16x128xf32>
    %c0_18 = arith.constant 0 : index
    %c0_19 = arith.constant 0 : index
    %c0_20 = arith.constant 0 : index
    %22 = vector.load %arg7[%c0_18, %c0_19, %c0_20] : memref<1x16x128xf32, #tpu.memory_space<vmem>>, vector<1x16x128xf32>
    %23 = vector.shape_cast %22 : vector<1x16x128xf32> to vector<16x128xf32>
    %24 = vector.shape_cast %21 : vector<16x128xf32> to vector<1x16x128xf32>
    tpu.vector_store %arg7[%c0_18, %c0_19, %c0_20], %24 {strides = array<i32>} : memref<1x16x128xf32, #tpu.memory_space<vmem>>, vector<1x16x128xf32>,
    return
  }
  func.func @transform_0(%arg0: i32) -> (i32, i32, i32) {
    %c0_i32 = arith.constant 0 : i32
    %c0_i32_0 = arith.constant 0 : i32
    %c0_i32_1 = arith.constant 0 : i32
    return %arg0, %c0_i32, %c0_i32_0 : i32, i32, i32
  }
  func.func @transform_1(%arg0: i32) -> (i32, i32, i32) {
    %c0_i32 = arith.constant 0 : i32
    %c0_i32_0 = arith.constant 0 : i32
    %c0_i32_1 = arith.constant 0 : i32
    return %arg0, %c0_i32, %c0_i32_0 : i32, i32, i32
  }
  func.func @transform_2(%arg0: i32) -> (i32, i32) {
    %c0_i32 = arith.constant 0 : i32
    %c0_i32_0 = arith.constant 0 : i32
    %c0_i32_1 = arith.constant 0 : i32
    return %c0_i32, %c0_i32_0 : i32, i32
  }
  func.func @transform_3(%arg0: i32) -> (i32, i32) {
    %c0_i32 = arith.constant 0 : i32
    %c0_i32_0 = arith.constant 0 : i32
    %c0_i32_1 = arith.constant 0 : i32
    return %c0_i32, %c0_i32_0 : i32, i32
  }
  func.func @transform_4(%arg0: i32) -> (i32, i32) {
    %c0_i32 = arith.constant 0 : i32
    %c0_i32_0 = arith.constant 0 : i32
    %c0_i32_1 = arith.constant 0 : i32
    return %c0_i32, %c0_i32_0 : i32, i32
  }
  func.func @transform_5(%arg0: i32) -> (i32, i32) {
    %c0_i32 = arith.constant 0 : i32
    %c0_i32_0 = arith.constant 0 : i32
    %c0_i32_1 = arith.constant 0 : i32
    return %c0_i32, %c0_i32_0 : i32, i32
  }
  func.func @transform_6(%arg0: i32) -> (i32, i32, i32) {
    %c0_i32 = arith.constant 0 : i32
    %c0_i32_0 = arith.constant 0 : i32
    %c0_i32_1 = arith.constant 0 : i32
    return %arg0, %c0_i32, %c0_i32_0 : i32, i32, i32
  }
}

</mosaic_0001>

<bundles_post_ra>
// kernel: tpu_custom_call.1
= control target key start
LH: loop header
LB: loop body
LE: loop exit
PB: predicated region body
PF: predicated region fallthrough
CT: control target
= control target key end

     0   :  { %s1536_s0 = inlined_call_operand.hbm [shape: f32[3,16,32], index: 0, kind: input, shape index: {}]   ;;  %s1537_s1 = inlined_call_operand.hbm [shape: f32[3,16,16], index: 1, kind: input, shape index: {}]   ;;  %s1538_s2 = inlined_call_operand.hbm [shape: f32[32,128], index: 2, kind: input, shape index: {}]   ;;  %s1539_s3 = inlined_call_operand.vmem [shape: f32[1,128], index: 3, kind: input, shape index: {}]   ;;  %s1540_s4 = inlined_call_operand.hbm [shape: f32[128,128], index: 4, kind: input, shape index: {}]   ;;  %s1541_s5 = inlined_call_operand.vmem [shape: f32[1,128], index: 5, kind: input, shape index: {}]   ;;  %s1542_s6 = inlined_call_operand.hbm [shape: f32[3,16,128], index: 6, kind: output, shape index: {}]  }
   0x1   :  { %1550 = sst [smem:[#allocation16_spill]] %s1536_s0 }
   0x2   :  { %1551 = sst [smem:[#allocation17_spill]] %s1538_s2 }
   0x3   :  { %1552 = sst [smem:[#allocation18_spill]] %s1540_s4 }
   0x4   :  { %11 = vsyncpa [#allocation3], 0 }
   0x5   :  { %13 = vsyncpa [#allocation3 + $0x1], 0 }
   0x6   :  { %14 = vsyncpa [#allocation6], 0 }
   0x7   :  { %16 = vsyncpa [#allocation6 + $0x1], 0 }
   0x8   :  { %17 = vsyncpa [#allocation9], 0 }
   0x9   :  { %18 = vsyncpa [#allocation4], 0 }
   0xa   :  { %20 = vsyncpa [#allocation4 + $0x1], 0  ;;  %s1263_s21 = smov 0   ;;  %s1265_s22 = smov 0  }
   0xb   :  { %s1267_s23 = smov 0   ;;  %s1269_s24 = smov 0  }
   0xc LB: > { %s1284_s25 = sadd.s32 4294967295, %s1217_s24   ;;  %s832_s26 = sadd.s32 4294967294, %s1217_s24   ;;  %s1217_s24 = sphi %s1269_s24, %s1574_s24   ;;  %s1213_s23 = sphi %s1267_s23, %s1573_s23   ;;  %s1209_s22 = sphi %s1265_s22, %s1572_s22   ;;  %s1205_s21 = sphi %s1263_s21, %s1571_s21  }
   0xd   : > { %p46_p0 = scmp.ne.s32.totalorder %s1209_s22, %s1205_s21  ;;  %p1547_p1 = scmp.eq.s32.totalorder %s1284_s25, 0 }
   0xe   : > { %p180_p2 = scmp.eq.s32.totalorder %s1284_s25, 2  ;;  %p186_p3 = scmp.eq.s32.totalorder %s832_s26, 2 }
   0xf   : > { %p1293_p4 = por %p1547_p1, %p46_p0  ;;  %p833_p5 = scmp.ge.s32.totalorder %s1217_s24, 1 }
  0x10   : > { %p1298_p6 = por %p186_p3, %p46_p0  ;;  %p193_p7 = scmp.lt.s32.totalorder %s1217_s24, 4 }
  0x11   : > { %s1553_s27 = scalar_select %p1293_p4, 1, 0 }
  0x12   : > { %s1554_s28 = scalar_select %p1298_p6, 1, 0 }
  0x13   : > { %p1303_p8 = pnand %p833_p5, %p193_p7  ;;  %s1219_s30 = smov [#allocation7]  }
  0x14   : > { %s205_s7 = sshll.u32 %s1219_s30, 4  ;;  %s1220_s9 = smov [#allocation8]   ;;  %s206_s7 = int_to_ptr.vmem [resolvable:$true] %s205_s7 }
  0x15   : > { %p971_p9 = pneg %p1303_p8  ;;  %s221_s10 = sshll.u32 %s1220_s9, 4  ;;  %s222_s10 = int_to_ptr.vmem [resolvable:$true] %s221_s10 }
  0x16   : > { %s1044_s11 = scalar_lea.vmem %s206_s7, 512  ;;  %p1052_p3 = scmp.lt.s32.totalorder %s206_s7, %s206_s7 }
  0x17   : > { %p1311_p10 = pnand %p971_p9, %p1547_p1  ;;  %p1045_p12 = scmp.ne.s32.totalorder %s206_s7, %s1044_s11 }
  0x18   : > { %p1053_p5 = scmp.lt.s32.totalorder %s1044_s11, %s1044_s11 }
  0x19   : > { %p1035_p11 = pneg %p1311_p10 }
  0x1a   : > { %p1054_p7 = por %p1053_p5, %p1052_p3 }
  0x1b   : > { %p1047_p13 = pnand %p1045_p12, %p1035_p11 }
  0x1d   : > { %p1048_p0 = pneg %p1047_p13 }
  0x1f   : > { %p1055_p9 = pnand %p1054_p7, %p1048_p0 }
  0x21   : > { %1058 = shalt.err (!%p1055_p9)
}
  0x22   : > { %s1543_s12 = smov 128   ;;  %s1545_s13 = smov 8  }
  0x23   : > { %s1557_s2 = sld [smem:[#allocation17_spill]]  ;;  %s1070_s16 = scalar_lea.vmem %s222_s10, 2048 }
  0x24   : > { %p1071_p12 = scmp.ne.s32.totalorder %s222_s10, %s1070_s16  ;;  %p1078_p0 = scmp.lt.s32.totalorder %s222_s10, %s222_s10 }
  0x25   : > { %p1079_p5 = scmp.lt.s32.totalorder %s1070_s16, %s1070_s16 }
  0x26   : > { %p1073_p13 = pnand %p1071_p12, %p1035_p11 }
  0x27   : > { %p1080_p7 = por %p1079_p5, %p1078_p0 }
  0x28   : > { %p1074_p3 = pneg %p1073_p13 }
  0x29   : > { %974 = dma.hbm_to_vmem [thread:$0]  (!%p1311_p10), %s1557_s2, 512, %s206_s7, [#allocation6], %s1543_s12, %s1543_s12, %s1545_s13  }
  0x2a   : > { %p1081_p9 = pnand %p1080_p7, %p1074_p3 }
  0x2c   : > { %1084 = shalt.err (!%p1081_p9)
}
  0x2d   : > { %s1558_s4 = sld [smem:[#allocation18_spill]]  ;;  %s1340_s19 = sadd.s32 1, %s1217_s24  }
  0x2e   : > { %s33_s20 = sadd.s32 1, %s1213_s23  ;;  %s30_s26 = ssub.s32 %s1217_s24, %s1340_s19 }
  0x2f   : > { %p40_p11 = scmp.ne.s32.totalorder %s1213_s23, %s1209_s22  ;;  %p31_p12 = scmp.eq.s32.totalorder %s30_s26, 0 }
  0x30   : > { %p41_p13 = scmp.eq.s32.totalorder %s1217_s24, 0  ;;  %p991_p0 = scmp.lt.s32.totalorder %s1217_s24, 3 }
  0x31   : > { %p1350_p3 = por %p180_p2, %p40_p11  ;;  %s238_s8 = sand.u32 1, %s1213_s23  }
  0x32   : > { %s1356_s7 = scalar_select %p31_p12, %s1213_s23, %s33_s20  }
  0x33   : > { %977 = dma.hbm_to_vmem [thread:$0]  (!%p1311_p10), %s1558_s4, 2048, %s222_s10, [#allocation9], %s1543_s12, %s1543_s12, %s1545_s13  }
  0x34   : > { %s1559_s30 = scalar_select %p1350_p3, 1, 0 }
  0x35   : > { %p42_p5 = por %p41_p13, %p40_p11  ;;  %s837_s9 = sshll.u32 %s238_s8, 4 }
  0x36   : > { %s862_s10 = sshll.u32 %s1217_s24, 8  ;;  %s1560_s0 = sld [smem:[#allocation16_spill]] }
  0x37   : > { %s242_s16 = scalar_lea.vmem [#allocation2], %s837_s9  ;;  %p1367_p2 = pnand %p991_p0, %p42_p5 }
  0x38   : > { %s249_s17 = sshll.u32 %s242_s16, 4  ;;  %s1374_s12 = scalar_lea.hbm %s1537_s1, %s862_s10  ;;  %s1365_s17 = int_to_ptr.vmem [resolvable:$true] %s249_s17 }
  0x39   : > { %s263_s11 = scalar_lea.vmem [#allocation5], %s837_s9  ;;  %s1378_s13 = scalar_lea.sflag [#allocation3], %s238_s8 }
  0x3a   : > { %s1376_s14 = sshll.u32 %s263_s11, 4  ;;  %p1087_p7 = pneg %p1367_p2  ;;  %s1409_s14 = int_to_ptr.vmem [resolvable:$true] %s1376_s14 }
  0x3c   : > { %s1363_s15 = scalar_lea.hbm %s1560_s0, %s862_s10  ;;  %s1090_s20 = scalar_lea.hbm %s1560_s0, 768 }
  0x3d   : > { %s1085_s2 = scalar_lea.hbm %s1363_s15, 256  ;;  %p1091_p12 = scmp.lt.s32.totalorder %s1363_s15, %s1560_s0 }
  0x3e   : > { %p1086_p10 = scmp.ne.s32.totalorder %s1363_s15, %s1085_s2  ;;  %p1092_p13 = scmp.lt.s32.totalorder %s1090_s20, %s1085_s2 }
  0x40   : > { %p1088_p9 = pnand %p1087_p7, %p1086_p10  ;;  %p1093_p0 = por %p1092_p13, %p1091_p12 }
  0x42   : > { %p1089_p11 = pneg %p1088_p9 }
  0x44   : > { %p1094_p5 = pnand %p1093_p0, %p1089_p11 }
  0x46   : > { %1097 = shalt.err (!%p1094_p5)
}
  0x47   : > { %s1098_s8 = scalar_lea.vmem %s1365_s17, 256  ;;  %s1223_s4 = smov [#allocation2]  }
  0x48   : > { %p1099_p1 = scmp.ne.s32.totalorder %s1365_s17, %s1098_s8  ;;  %s1103_s9 = sshll.u32 %s1223_s4, 4  ;;  %s1104_s9 = int_to_ptr.vmem [resolvable:$false] %s1103_s9 }
  0x49   : > { %s1105_s11 = scalar_lea.vmem %s1104_s9, 512  ;;  %p1106_p6 = scmp.lt.s32.totalorder %s1365_s17, %s1104_s9 }
  0x4a   : > { %p1101_p10 = pnand %p1099_p1, %p1087_p7  ;;  %p1107_p3 = scmp.lt.s32.totalorder %s1105_s11, %s1098_s8 }
  0x4c   : > { %p1102_p9 = pneg %p1101_p10  ;;  %p1108_p4 = por %p1107_p3, %p1106_p6 }
  0x4e   : > { %p1109_p12 = pnand %p1108_p4, %p1102_p9 }
  0x50   : > { %1112 = shalt.err (!%p1109_p12)
}
  0x51   : > { %s1562_s2 = smov 8   ;;  %s1563_s16 = smov 128  }
  0x52   : > { %981 = dma.hbm_to_vmem [thread:$0]  (!%p1367_p2), %s1363_s15, 256, %s1365_s17, %s1378_s13, %s1563_s16, %s1563_s16, %s1562_s2  }
  0x53   : > { %s259_s20 = sand.u32 1, %s1217_s24   ;;  %s1113_s10 = scalar_lea.hbm %s1374_s12, 256 }
  0x54   : > { %s260_s26 = scalar_lea.sflag [#allocation6], %s259_s20  ;;  %p1114_p1 = scmp.ne.s32.totalorder %s1374_s12, %s1113_s10 }
  0x55   : > { %s1118_s9 = scalar_lea.hbm %s1537_s1, 768  ;;  %p1119_p3 = scmp.lt.s32.totalorder %s1374_s12, %s1537_s1 }
  0x56   : > { %p1116_p4 = pnand %p1114_p1, %p1087_p7  ;;  %p1120_p11 = scmp.lt.s32.totalorder %s1118_s9, %s1113_s10 }
  0x58   : > { %p1117_p6 = pneg %p1116_p4  ;;  %p1121_p13 = por %p1120_p11, %p1119_p3 }
  0x5a   : > { %p1122_p0 = pnand %p1121_p13, %p1117_p6 }
  0x5c   : > { %1125 = shalt.err (!%p1122_p0)
}
  0x5d   : > { %s1126_s13 = scalar_lea.vmem %s1409_s14, 256  ;;  %s1224_s15 = smov [#allocation5]  }
  0x5e   : > { %p1127_p5 = scmp.ne.s32.totalorder %s1409_s14, %s1126_s13  ;;  %s1131_s17 = sshll.u32 %s1224_s15, 4  ;;  %s1132_s17 = int_to_ptr.vmem [resolvable:$false] %s1131_s17 }
  0x5f   : > { %s1133_s20 = scalar_lea.vmem %s1132_s17, 512  ;;  %p1134_p12 = scmp.lt.s32.totalorder %s1409_s14, %s1132_s17 }
  0x60   : > { %p1129_p10 = pnand %p1127_p5, %p1087_p7  ;;  %p1135_p1 = scmp.lt.s32.totalorder %s1133_s20, %s1126_s13 }
  0x62   : > { %p1130_p9 = pneg %p1129_p10  ;;  %p1136_p4 = por %p1135_p1, %p1134_p12 }
  0x64   : > { %p1137_p3 = pnand %p1136_p4, %p1130_p9 }
  0x66   : > { %1140 = shalt.err (!%p1137_p3)
}
  0x67   : > { %984 = dma.hbm_to_vmem [thread:$0]  (!%p1367_p2), %s1374_s12, 256, %s1409_s14, %s260_s26, %s1563_s16, %s1563_s16, %s1562_s2  }
  0x68   : > { %282 = sbr.rel (%p1303_p8) target bundleno = 929 (0x3a1), region = 44  ;;  %s1440_s0 = sand.u32 (!%p1303_p8), 1, %s1209_s22  }
  0x69   : > { %s1443_s10 = sshll.u32 (!%p1303_p8), %s1440_s0, 4  ;;  %s285_s8 = scalar_lea.sflag (!%p1303_p8), [#allocation3], %s1440_s0 }
  0x6a   : > { %s288_s18 = scalar_lea.vmem (!%p1303_p8), [#allocation2], %s1443_s10  ;;  %p1564_p7 = scmp.ne.s32.totalorder (!%p1303_p8), %s1553_s27, 0 }
  0x6d   : > { %1184 = dma.done.wait (%p1564_p7), %s285_s8, 256  }
  0x6e   : > { %1186 = vsyncadd (%p1564_p7), %s285_s8, 4294967040  ;;  %s293_s29 = sand.u32 1, %s1284_s25   ;;  %s297_s14 = scalar_lea.vmem [#allocation5], %s1443_s10 }
  0x6f   : > { %s294_s12 = scalar_lea.sflag [#allocation6], %s293_s29 }
  0x70   : > { %1188 = dma.done.wait (%p1564_p7), %s294_s12, 256  }
  0x71   : > { %1190 = vsyncadd (%p1564_p7), %s294_s12, 4294967040  ;;  %p1565_p8 = scmp.eq.s32.totalorder %s1284_s25, 0 }
  0x73   : > { %1192 = dma.done.wait (%p1565_p8), [#allocation6], 512   ;;  %p1566_p2 = pmov %p1565_p8 }
  0x75   : > { %1194 = vsyncadd (%p1566_p2), [#allocation6], 4294966784  ;;  %p1567_p6 = pmov %p1566_p2 }
  0x76   : > { %p1568_p11 = pmov %p1566_p2 }
  0x77   : > { %1196 = dma.done.wait (%p1567_p6), [#allocation9], 2048  }
  0x78   : > { %1198 = vsyncadd (%p1568_p11), [#allocation9], 4294965248  ;;  %vm341_vm0 = vcmask 130048   ;;  %v349_v0 = vld [vmem:[%s288_s18 + $0x8] sm:$0xff]  ;;  %v348_v1 = vld [vmem:[%s288_s18] sm:$0xff]  ;;  %vm444_vm1 = vcmask 261120  }
  0x79   : > { %v1465_v2 = vld [vmem:[%s297_s14] sm:$0xff]  ;;  %897 = vmatprep.subr.mxu1 %v349_v0  ;;  %v1469_v3 = vld [vmem:[%s297_s14 + $0x8] sm:$0xff]  ;;  %s338_s4 = scalar_lea.vmem [#allocation10], %s1443_s10  ;;  %s864_s11 = sshll.u32 %s1284_s25, 8 }
  0x7a   : > { %901 = vmatprep.mubr.msk.f32.mxu1 %vm341_vm0, %v1465_v2  ;;  %898 = vmatpush3.msra.mxu1 %v349_v0  ;;  %v434_v4 = vld [vmem:[#allocation7 + $0x18] sm:$0xff]  ;;  %v433_v5 = vld [vmem:[#allocation7 + $0x10] sm:$0xff]  ;;  %v432_v6 = vld [vmem:[#allocation7 + $0x8] sm:$0xff]  ;;  %v342_v8 = vsel %vm341_vm0, %v1465_v2, 0.0  ;;  %v345_v11 = vsel %vm341_vm0, %v1469_v3, 0.0  ;;  %s717_s9 = sshll.u32 %s338_s4, 4  ;;  %s1494_s17 = scalar_lea.hbm %s1542_s6, %s864_s11  ;;  %s1489_s9 = int_to_ptr.vmem [resolvable:$true] %s717_s9 }
  0x7b   : > { %899 = vmatprep.subr.mxu1 %v348_v1  ;;  %v431_v7 = vld [vmem:[#allocation7] sm:$0xff]  ;;  %v543_v9 = vld [vmem:[#allocation8 + $0x78] sm:$0xff]  ;;  %v542_v10 = vld [vmem:[#allocation8 + $0x70] sm:$0xff]  ;;  %343 = vadd.xlane.f32.xlu0 %v342_v8  ;;  %s704_s20 = scalar_lea.sflag [#allocation4], %s1440_s0  ;;  %s1141_s8 = scalar_lea.vmem %s1489_s9, 256 }
  0x7c   : > { %900 = vmatpush3.msra.mxu1 %v348_v1  ;;  %915 = vmatprep.subr.mxu0 %v543_v9  ;;  %v541_v12 = vld [vmem:[#allocation8 + $0x68] sm:$0xff]  ;;  %v540_v13 = vld [vmem:[#allocation8 + $0x60] sm:$0xff]  ;;  %v539_v14 = vld [vmem:[#allocation8 + $0x58] sm:$0xff]  ;;  %p1142_p13 = scmp.ne.s32.totalorder %s1489_s9, %s1141_s8  ;;  %p1569_p0 = scmp.ne.s32.totalorder %s1559_s30, 0 }
  0x7d   : > { %902 = vmatmul.mubr.msk.f32.vlgmr.msra.gmra.mxu1 %vm341_vm0, %v1469_v3  ;;  %904 = vmatprep.subr.mxu1 %v434_v4  ;;  %v538_v15 = vld [vmem:[#allocation8 + $0x50] sm:$0xff]  ;;  %v537_v16 = vld [vmem:[#allocation8 + $0x48] sm:$0xff]  ;;  %v536_v17 = vld [vmem:[#allocation8 + $0x40] sm:$0xff]  ;;  %s1225_s25 = smov [#allocation10]  }
  0x7e   : > { %905 = vmatpush3.msra.mxu1 %v434_v4  ;;  %916 = vmatpush3.msra.mxu0 %v543_v9  ;;  %v535_v18 = vld [vmem:[#allocation8 + $0x38] sm:$0xff]  ;;  %v534_v19 = vld [vmem:[#allocation8 + $0x30] sm:$0xff]  ;;  %v533_v20 = vld [vmem:[#allocation8 + $0x28] sm:$0xff]  ;;  %p1143_p5 = pnand %p1142_p13, %p1569_p0  ;;  %s1145_s10 = sshll.u32 %s1225_s25, 4  ;;  %s1146_s10 = int_to_ptr.vmem [resolvable:$false] %s1145_s10 }
  0x7f   : > { %906 = vmatprep.subr.mxu1 %v433_v5  ;;  %917 = vmatprep.subr.mxu0 %v542_v10  ;;  %v532_v21 = vld [vmem:[#allocation8 + $0x20] sm:$0xff]  ;;  %v531_v24 = vld [vmem:[#allocation8 + $0x18] sm:$0xff]  ;;  %v530_v25 = vld [vmem:[#allocation8 + $0x10] sm:$0xff]  ;;  %s1147_s18 = scalar_lea.vmem %s1146_s10, 512  ;;  %p1148_p9 = scmp.lt.s32.totalorder %s1489_s9, %s1146_s10 }
  0x80   : > { %907 = vmatpush3.msra.mxu1 %v433_v5  ;;  %918 = vmatpush3.msra.mxu0 %v542_v10  ;;  %v529_v26 = vld [vmem:[#allocation8 + $0x8] sm:$0xff]  ;;  %v528_v27 = vld [vmem:[#allocation8] sm:$0xff]  ;;  %p1144_p10 = pneg %p1143_p5  ;;  %p1149_p12 = scmp.lt.s32.totalorder %s1147_s18, %s1141_s8 }
  0x81   : > { %908 = vmatprep.subr.mxu1 %v432_v6  ;;  %346 = vadd.xlane.f32.xlu0 %v345_v11  ;;  %v851_v29 = vld [vmem:[%s1539_s3] ss:$0 sm:$0xff] }
  0x82   : > { %909 = vmatpush3.msra.mxu1 %v432_v6  ;;  %919 = vmatprep.subr.mxu0 %v541_v12  ;;  %v854_v39 = vld [vmem:[%s1541_s5] ss:$0 sm:$0xff]  ;;  %p1150_p1 = por %p1149_p12, %p1148_p9 }
  0x83   : > { %910 = vmatprep.subr.mxu1 %v431_v7  ;;  %920 = vmatpush3.msra.mxu0 %v541_v12 }
  0x84   : > { %911 = vmatpush3.msra.mxu1 %v431_v7  ;;  %921 = vmatprep.subr.mxu0 %v540_v13  ;;  %p1151_p4 = pnand %p1150_p1, %p1144_p10 }
  0x85   : > { %922 = vmatpush3.msra.mxu0 %v540_v13 }
  0x86   : > { %923 = vmatprep.subr.mxu0 %v539_v14 }
  0x87   : > { %924 = vmatpush3.msra.mxu0 %v539_v14 }
  0x88   : > { %925 = vmatprep.subr.mxu0 %v538_v15 }
  0x89   : > { %926 = vmatpush3.msra.mxu0 %v538_v15 }
  0x8a   : > { %927 = vmatprep.subr.mxu0 %v537_v16 }
  0x8b   : > { %928 = vmatpush3.msra.mxu0 %v537_v16 }
  0x8c   : > { %929 = vmatprep.subr.mxu0 %v536_v17 }
  0x8d   : > { %930 = vmatpush3.msra.mxu0 %v536_v17 }
  0x8e   : > { %931 = vmatprep.subr.mxu0 %v535_v18 }
  0x8f   : > { %932 = vmatpush3.msra.mxu0 %v535_v18 }
  0x90   : > { %933 = vmatprep.subr.mxu0 %v534_v19 }
  0x91   : > { %934 = vmatpush3.msra.mxu0 %v534_v19 }
  0x92   : > { %935 = vmatprep.subr.mxu0 %v533_v20 }
  0x93   : > { %936 = vmatpush3.msra.mxu0 %v533_v20 }
  0x94   : > { %937 = vmatprep.subr.mxu0 %v532_v21 }
  0x95   : > { %938 = vmatpush3.msra.mxu0 %v532_v21 }
  0x96   : > { %939 = vmatprep.subr.mxu0 %v531_v24 }
  0x97   : > { %940 = vmatpush3.msra.mxu0 %v531_v24 }
  0x98   : > { %941 = vmatprep.subr.mxu0 %v530_v25 }
  0x99   : > { %942 = vmatpush3.msra.mxu0 %v530_v25 }
  0x9a   : > { %943 = vmatprep.subr.mxu0 %v529_v26 }
  0x9b   : > { %944 = vmatpush3.msra.mxu0 %v529_v26 }
  0x9c   : > { %945 = vmatprep.subr.mxu0 %v528_v27 }
  0x9d   : > { %946 = vmatpush3.msra.mxu0 %v528_v27 }
 0x104   : > { %v344_v28 = vpop.xlane.xlu0 %343 }
 0x105   : > { %v442_v33 = vmul.f32 %v851_v29, %v344_v28 }
 0x10a   : > { %v347_v30 = vpop.xlane.xlu0 %346 }
 0x10b   : > { %v443_v31 = vmul.f32 %v851_v29, %v347_v30 }
 0x13d   : > { %v903_v22 = vpop.f32.mrf.mxu1 }
 0x13f   : > { %v422_v23 = vpop.f32.mrf.mxu1 }
 0x140   : > { %912 = vmatprep.mubr.msk.f32.mxu1 %vm444_vm1, %v422_v23 }
 0x141   : > { %913 = vmatmul.mubr.msk.f32.vlgmr.msra.gmra.mxu1 %vm444_vm1, %v903_v22 }
 0x142   : > { %954 = vmatprep.mubr.msk.f32.mxu1 %vm341_vm0, %v1465_v2 }
 0x201   : > { %v914_v32 = vpop.f32.mrf.mxu1 }
 0x202   : > { %v523_v34 = vadd.f32 %v914_v32, %v443_v31 }
 0x203   : > { %v517_v35 = vpop.f32.mrf.mxu1 }
 0x204   : > { %v518_v36 = vadd.f32 %v517_v35, %v442_v33  ;;  %v527_v38 = vmax.f32 %v523_v34, 0.0 }
 0x206   : > { %v526_v37 = vmax.f32 %v518_v36, 0.0 }
 0x208   : > { %947 = vmatprep.mubr.f32.mxu0 %v526_v37 }
 0x209   : > { %948 = vmatmul.mubr.f32.vlgmr.msra.gmra.mxu0 %v527_v38 }
 0x2c9   : > { %v949_v40 = vpop.f32.mrf.mxu0 }
 0x2ca   : > { %v623_v41 = vadd.f32 %v949_v40, %v854_v39 }
 0x2cb   : > { %v617_v42 = vpop.f32.mrf.mxu0 }
 0x2cc   : > { %v618_v43 = vadd.f32 %v854_v39, %v617_v42  ;;  %950 = vmatprep.subr.mxu1 %v623_v41 }
 0x2cd   : > { %951 = vmatpush3.msra.mxu1 %v623_v41 }
 0x2ce   : > { %952 = vmatprep.subr.mxu1 %v618_v43 }
 0x2cf   : > { %953 = vmatpush3.msra.mxu1 %v618_v43 }
 0x2d0   : > { %955 = vmatmul.mubr.msk.f32.vlgmr.msra.gmra.mxu1 %vm341_vm0, %v1469_v3 }
 0x390   : > { %v956_v44 = vpop.f32.mrf.mxu1 }
 0x391   : > { %702 = vst [vmem:[%s338_s4 + $0x8] sm:$0xff] %v956_v44 }
 0x392   : > { %v692_v45 = vpop.f32.mrf.mxu1 }
 0x393   : > { %701 = vst [vmem:[%s338_s4] sm:$0xff] %v692_v45 }
 0x394   : > { %1154 = shalt.err (!%p1151_p4)
}
 0x395   : > { %s1155_s29 = scalar_lea.hbm %s1494_s17, 256  ;;  %s1159_s27 = scalar_lea.hbm %s1542_s6, 768 }
 0x396   : > { %p1156_p3 = scmp.ne.s32.totalorder %s1494_s17, %s1155_s29  ;;  %p1160_p2 = scmp.lt.s32.totalorder %s1494_s17, %s1542_s6 }
 0x397   : > { %p1161_p6 = scmp.lt.s32.totalorder %s1159_s27, %s1155_s29 }
 0x398   : > { %p1157_p7 = pnand %p1156_p3, %p1569_p0 }
 0x399   : > { %p1162_p11 = por %p1161_p6, %p1160_p2 }
 0x39a   : > { %p1158_p8 = pneg %p1157_p7 }
 0x39c   : > { %p1163_p13 = pnand %p1162_p11, %p1158_p8 }
 0x39e   : > { %1166 = shalt.err (!%p1163_p13)
}
 0x39f   : > { %s1226_s26 = smov 128   ;;  %s1227_s4 = smov 8  }
 0x3a0   : > { %969 = dma.vmem_to_hbm [thread:$0]  (%p1569_p0), %s1489_s9, 256, %s1494_s17, %s704_s20, %s1226_s26, %s1226_s26, %s1227_s4  }
 0x3a1 PF: > { %p994_p5 = scmp.ge.s32.totalorder %s1217_s24, 2  ;;  %s732_s11 = sand.u32 1, %s1205_s21  }
 0x3a2   : > { %p1570_p10 = scmp.ne.s32.totalorder %s1554_s28, 0  ;;  %s733_s13 = scalar_lea.sflag [#allocation4], %s732_s11 }
 0x3a4   : > { %p986_p9 = pnand %p994_p5, %p1570_p10 }
 0x3a6   : > { %p987_p12 = pneg %p986_p9 }
 0x3a8   : > { %1200 = dma.done.wait (%p987_p12), %s733_s13, 256  }
 0x3a9   : > { %1202 = vsyncadd (%p987_p12), %s733_s13, 4294967040  ;;  %p23_p1 = scmp.ge.s32.totalorder %s1340_s19, 5   ;;  %s1571_s21 = smov %s1209_s22 }
 0x3aa   : > { %s1572_s22 = smov %s1213_s23  ;;  %s1573_s23 = smov %s1356_s7 }
 0x3ab   : > { %s1574_s24 = smov %s1340_s19  ;;  %25 = sbr.rel (!%p23_p1) target bundleno = 12 (0xc), region = 110 }
 0x3b0   :  { %738 = vsyncpa [#allocation3], 1 }
 0x3b1   :  { %740 = vsyncpa [#allocation3 + $0x1], 1 }
 0x3b2   :  { %741 = vsyncpa [#allocation6], 1 }
 0x3b3   :  { %743 = vsyncpa [#allocation6 + $0x1], 1 }
 0x3b4   :  { %744 = vsyncpa [#allocation9], 1 }
 0x3b5   :  { %745 = vsyncpa [#allocation4], 1 }
 0x3b6   :  { %747 = vsyncpa [#allocation4 + $0x1], 1 }

</bundles_post_ra>
